<compile_context>
chip_gen: v5e
topology: v5e:2x2
jax: 0.10.0
libtpu: 0.0.40
codegen_flags: <defaults>
</compile_context>

<pallas_src>
import jax
import jax.numpy as jnp
from jax.experimental import pallas as pl
from jax.experimental.pallas import tpu as pltpu

H1 = 32          # fc1 width
H2 = 16          # fc2 width (feat)
H_PACK = 32      # packed output width: [feat(16) | score(1) | pad(15)]
SCORE_COL = H2   # column holding the sigmoid(fc3) score

_LANE = 128
_SUBLANE = 8


def _round_up(n, m):
    return ((n + m - 1) // m) * m


def mlp_kernel(x_ref, w1_ref, b1_ref, wc_ref, bc_ref, out_ref):
    # fc1 + ReLU. x arrives in its HBM dtype; cast to bf16 on the VPU just
    # before the MXU dot (free vs. the HBM-bound input stream). f32 accumulate.
    x = x_ref[...].astype(w1_ref.dtype)                               # (TB, D) bf16
    h1 = jnp.dot(x, w1_ref[...], preferred_element_type=jnp.float32) + b1_ref[...]
    h1 = jnp.maximum(h1, 0.0)                                         # f32; dropout == identity (eval)

    # Fused fc2/fc3 in one tiny 32x32 f32 matmul: cols 0:16 = feat, col 16 = logit.
    y = jnp.dot(h1, wc_ref[...], preferred_element_type=jnp.float32) + bc_ref[...]

    # Apply sigmoid only to the logit column via a lane mask (no lane slicing).
    col = jax.lax.broadcasted_iota(jnp.int32, y.shape, 1)
    packed = jnp.where(col == SCORE_COL, jax.nn.sigmoid(y), y)
    out_ref[...] = packed.astype(out_ref.dtype)                       # bf16 store


def network_forward_packed(x, params, *, tile_b=8192):
    """Runs the fused MLP; returns packed (B, 32) bf16:
       [:, :16] = fc2 features, [:, 16] = sigmoid(fc3) score."""
    w1, b1, w2, b2, w3, b3 = params
    B, D = x.shape

    # --- host-side param prep (tiny; fuses under jit with the kernel) -----
    # logit = (h1@W2 + b2)@W3 + b3 = h1@(W2@W3) + (b2@W3 + b3)   (eval mode)
    wc = jnp.concatenate(
        [w2, w2 @ w3, jnp.zeros((H1, H_PACK - H2 - 1), jnp.float32)], axis=1)
    bc = jnp.concatenate(
        [b2, b2 @ w3 + b3, jnp.zeros((1, H_PACK - H2 - 1), jnp.float32)], axis=1)
    w1_bf = w1.astype(jnp.bfloat16)          # large weight bf16; fused 32x32 stays f32
    b1_f = b1.astype(jnp.float32)

    # --- batch-tile selection ---------------------------------------------
    x_elem_bytes = jnp.dtype(x.dtype).itemsize
    lane_d = _round_up(D, _LANE)
    # double-buffered per-row VMEM: x tile + lane-padded bf16 output tile
    per_row = 2 * (lane_d * x_elem_bytes + _LANE * 2)
    resident = (_round_up(D, 16) * _LANE * 2        # W1 (bf16, lane-padded)
                + _round_up(H1, 8) * _LANE * 4      # Wc (f32)
                + 2 * _SUBLANE * _LANE * 4)         # biases
    budget = 24 * 1024 * 1024                       # conservative across v5e/v6e/v7x
    tb_cap = max(_SUBLANE,
                 ((budget - 2 * resident) // per_row) // _SUBLANE * _SUBLANE)

    b8 = _round_up(B, _SUBLANE)
    # Keep >= 2 grid blocks when possible so both v7x TensorCores get work.
    tb_half = max(_SUBLANE, _round_up(pl.cdiv(b8, 2), _SUBLANE))
    tb = max(_SUBLANE, min(tile_b, tb_cap, tb_half))
    n_blocks = pl.cdiv(B, tb)                       # partial last block: no jnp.pad

    cost = pl.CostEstimate(
        flops=2 * B * (D * H1 + H1 * H_PACK),
        transcendentals=B * H_PACK,
        bytes_accessed=(B * D * x_elem_bytes        # x in
                        + D * H1 * 2 + H1 * H_PACK * 4 + 2 * H_PACK * 4   # weights
                        + B * H_PACK * 2),          # packed bf16 out
    )

    packed = pl.pallas_call(
        mlp_kernel,
        out_shape=jax.ShapeDtypeStruct((B, H_PACK), jnp.bfloat16),
        grid=(n_blocks,),
        in_specs=[
            pl.BlockSpec((tb, D), lambda i: (i, 0)),        # x: streamed per batch tile
            pl.BlockSpec((D, H1), lambda i: (0, 0)),        # resident weights
            pl.BlockSpec((1, H1), lambda i: (0, 0)),
            pl.BlockSpec((H1, H_PACK), lambda i: (0, 0)),
            pl.BlockSpec((1, H_PACK), lambda i: (0, 0)),
        ],
        out_specs=pl.BlockSpec((tb, H_PACK), lambda i: (i, 0)),
        compiler_params=pltpu.CompilerParams(
            dimension_semantics=("parallel",),              # megacore / 2-TC sharding
            vmem_limit_bytes=32 * 1024 * 1024,
        ),
        cost_estimate=cost,
    )(x, w1_bf, b1_f, wc, bc)
    return packed


def network_forward(x, params, *, tile_b=8192):
    """Matches the PyTorch module API: returns [out (B,1) f32, feat (B,16) f32].

    Prefer network_forward_packed downstream: it avoids the two post-kernel
    slice passes over the output (the casts below fuse with the slices)."""
    packed = network_forward_packed(x, params, tile_b=tile_b)
    feat = packed[:, :H2].astype(jnp.float32)
    out = packed[:, SCORE_COL:SCORE_COL + 1].astype(jnp.float32)
    return [out, feat]


def init_params(key, input_dim):
    """Deterministic parameter init (uniform like torch.nn.Linear default)."""
    ks = jax.random.split(key, 6)

    def linear_init(kw, kb, fan_in, fan_out):
        bound = 1.0 / jnp.sqrt(float(fan_in))
        w = jax.random.uniform(kw, (fan_in, fan_out), jnp.float32, -bound, bound)
        b = jax.random.uniform(kb, (1, fan_out), jnp.float32, -bound, bound)
        return w, b

    w1, b1 = linear_init(ks[0], ks[1], input_dim, H1)
    w2, b2 = linear_init(ks[2], ks[3], H1, H2)
    w3, b3 = linear_init(ks[4], ks[5], H2, 1)
    return (w1, b1, w2, b2, w3, b3)


def _reference(x, params):
    w1, b1, w2, b2, w3, b3 = params
    h1 = jnp.maximum(x @ w1 + b1, 0.0)
    feat = h1 @ w2 + b2
    out = jax.nn.sigmoid(feat @ w3 + b3)
    return out, feat


if __name__ == "__main__":
    key = jax.random.PRNGKey(0)
    k_x, k_p, k_x2 = jax.random.split(key, 3)

    input_dim = 64
    params = init_params(k_p, input_dim)
    fwd = jax.jit(network_forward)

    # Case 1: small, tile-aligned batch (8 instances, 64-dim features).
    B1 = 8
    x1 = jax.random.normal(k_x, (B1, input_dim), dtype=jnp.float32)
    out1, feat1 = fwd(x1, params)
    jax.block_until_ready(out1)
    jax.block_until_ready(feat1)
    out1_ref, feat1_ref = _reference(x1, params)
    assert out1.shape == (B1, 1) and feat1.shape == (B1, H2)
    assert jnp.allclose(out1, out1_ref, atol=2e-2), "out mismatch (B=8)"
    assert jnp.allclose(feat1, feat1_ref, atol=5e-2, rtol=5e-2), "feat mismatch (B=8)"

    # Case 2: ragged batch (exercises the pad-free partial last block).
    B2 = 13
    x2 = jax.random.normal(k_x2, (B2, input_dim), dtype=jnp.float32)
    out2, feat2 = fwd(x2, params)
    jax.block_until_ready(out2)
    jax.block_until_ready(feat2)
    out2_ref, feat2_ref = _reference(x2, params)
    assert out2.shape == (B2, 1) and feat2.shape == (B2, H2)
    assert jnp.allclose(out2, out2_ref, atol=2e-2), "out mismatch (B=13)"
    assert jnp.allclose(feat2, feat2_ref, atol=5e-2, rtol=5e-2), "feat mismatch (B=13)"

    print("KERNEL_OK")
</pallas_src>

<mosaic_0001>
module attributes {stable_mosaic.version = 11 : i64} {
  func.func @mlp_kernel(%arg0: i32, %arg1: memref<8x64xf32, #tpu.memory_space<vmem>>, %arg2: memref<64x32xbf16, #tpu.memory_space<vmem>>, %arg3: memref<1x32xf32, #tpu.memory_space<vmem>>, %arg4: memref<32x32xf32, #tpu.memory_space<vmem>>, %arg5: memref<1x32xf32, #tpu.memory_space<vmem>>, %arg6: memref<8x32xbf16, #tpu.memory_space<vmem>>) attributes {dimension_semantics = [#tpu.dimension_semantics<parallel>], iteration_bounds = array<i64: 1>, scalar_prefetch = 0 : i64, scratch_operands = 0 : i64, tpu.core_type = #tpu.core_type<tc>, window_params = [{transform_indices = @transform_0, window_bounds = array<i64: 8, 64>}, {pipeline_mode = #tpu.pipeline_mode<synchronous>, transform_indices = @transform_1, window_bounds = array<i64: 64, 32>}, {pipeline_mode = #tpu.pipeline_mode<synchronous>, transform_indices = @transform_2, window_bounds = array<i64: 1, 32>}, {pipeline_mode = #tpu.pipeline_mode<synchronous>, transform_indices = @transform_3, window_bounds = array<i64: 32, 32>}, {pipeline_mode = #tpu.pipeline_mode<synchronous>, transform_indices = @transform_4, window_bounds = array<i64: 1, 32>}, {transform_indices = @transform_5, window_bounds = array<i64: 8, 32>}]} {
    %c0 = arith.constant 0 : index
    %c0_0 = arith.constant 0 : index
    %0 = vector.load %arg1[%c0, %c0_0] : memref<8x64xf32, #tpu.memory_space<vmem>>, vector<8x64xf32>
    %1 = arith.truncf %0 : vector<8x64xf32> to vector<8x64xbf16>
    %c0_1 = arith.constant 0 : index
    %c0_2 = arith.constant 0 : index
    %2 = vector.load %arg2[%c0_1, %c0_2] : memref<64x32xbf16, #tpu.memory_space<vmem>>, vector<64x32xbf16>
    %cst = arith.constant dense<0.000000e+00> : vector<8x32xf32>
    %3 = tpu.matmul %1, %2, %cst {dimension_numbers = #tpu.dot_dimension_numbers<[1], [0], [0], [1], [0, 0, 1, 1], [], []>} : vector<8x64xbf16>, vector<64x32xbf16>, vector<8x32xf32> -> vector<8x32xf32>
    %c0_3 = arith.constant 0 : index
    %c0_4 = arith.constant 0 : index
    %4 = vector.load %arg3[%c0_3, %c0_4] : memref<1x32xf32, #tpu.memory_space<vmem>>, vector<1x32xf32>
    %5 = vector.broadcast %4 : vector<1x32xf32> to vector<8x32xf32>
    %6 = arith.addf %3, %5 : vector<8x32xf32>
    %cst_5 = arith.constant 0.000000e+00 : f32
    %7 = vector.broadcast %cst_5 : f32 to vector<8x32xf32>
    %8 = arith.maximumf %6, %7 : vector<8x32xf32>
    %c0_6 = arith.constant 0 : index
    %c0_7 = arith.constant 0 : index
    %9 = vector.load %arg4[%c0_6, %c0_7] : memref<32x32xf32, #tpu.memory_space<vmem>>, vector<32x32xf32>
    %cst_8 = arith.constant dense<0.000000e+00> : vector<8x32xf32>
    %10 = tpu.matmul %8, %9, %cst_8 {dimension_numbers = #tpu.dot_dimension_numbers<[1], [0], [0], [1], [0, 0, 1, 1], [], []>} : vector<8x32xf32>, vector<32x32xf32>, vector<8x32xf32> -> vector<8x32xf32>
    %c0_9 = arith.constant 0 : index
    %c0_10 = arith.constant 0 : index
    %11 = vector.load %arg5[%c0_9, %c0_10] : memref<1x32xf32, #tpu.memory_space<vmem>>, vector<1x32xf32>
    %12 = vector.broadcast %11 : vector<1x32xf32> to vector<8x32xf32>
    %13 = arith.addf %10, %12 : vector<8x32xf32>
    %14 = tpu.iota {dimensions = array<i32: 1>} : vector<8x32xi32>
    %c16_i32 = arith.constant 16 : i32
    %15 = vector.broadcast %c16_i32 : i32 to vector<8x32xi32>
    %16 = arith.cmpi eq, %14, %15 : vector<8x32xi32>
    %17 = arith.negf %13 : vector<8x32xf32>
    %18 = math.exp %17 : vector<8x32xf32>
    %cst_11 = arith.constant 1.000000e+00 : f32
    %19 = vector.broadcast %cst_11 : f32 to vector<8x32xf32>
    %20 = arith.addf %19, %18 : vector<8x32xf32>
    %21 = arith.divf %19, %20 : vector<8x32xf32>
    %22 = arith.select %16, %21, %13 : vector<8x32xi1>, vector<8x32xf32>
    %23 = arith.truncf %22 : vector<8x32xf32> to vector<8x32xbf16>
    %c0_12 = arith.constant 0 : index
    %c0_13 = arith.constant 0 : index
    %24 = vector.load %arg6[%c0_12, %c0_13] : memref<8x32xbf16, #tpu.memory_space<vmem>>, vector<8x32xbf16>
    tpu.vector_store %arg6[%c0_12, %c0_13], %23 {strides = array<i32>} : memref<8x32xbf16, #tpu.memory_space<vmem>>, vector<8x32xbf16>,
    return
  }
  func.func @transform_0(%arg0: i32) -> (i32, i32) {
    %c0_i32 = arith.constant 0 : i32
    %c0_i32_0 = arith.constant 0 : i32
    return %arg0, %c0_i32 : i32, i32
  }
  func.func @transform_1(%arg0: i32) -> (i32, i32) {
    %c0_i32 = arith.constant 0 : i32
    %c0_i32_0 = arith.constant 0 : i32
    %c0_i32_1 = arith.constant 0 : i32
    return %c0_i32, %c0_i32_0 : i32, i32
  }
  func.func @transform_2(%arg0: i32) -> (i32, i32) {
    %c0_i32 = arith.constant 0 : i32
    %c0_i32_0 = arith.constant 0 : i32
    %c0_i32_1 = arith.constant 0 : i32
    return %c0_i32, %c0_i32_0 : i32, i32
  }
  func.func @transform_3(%arg0: i32) -> (i32, i32) {
    %c0_i32 = arith.constant 0 : i32
    %c0_i32_0 = arith.constant 0 : i32
    %c0_i32_1 = arith.constant 0 : i32
    return %c0_i32, %c0_i32_0 : i32, i32
  }
  func.func @transform_4(%arg0: i32) -> (i32, i32) {
    %c0_i32 = arith.constant 0 : i32
    %c0_i32_0 = arith.constant 0 : i32
    %c0_i32_1 = arith.constant 0 : i32
    return %c0_i32, %c0_i32_0 : i32, i32
  }
  func.func @transform_5(%arg0: i32) -> (i32, i32) {
    %c0_i32 = arith.constant 0 : i32
    %c0_i32_0 = arith.constant 0 : i32
    return %arg0, %c0_i32 : i32, i32
  }
}

</mosaic_0001>

<bundles_post_ra>
// kernel: network_forward.1
= control target key start
LH: loop header
LB: loop body
LE: loop exit
PB: predicated region body
PF: predicated region fallthrough
CT: control target
= control target key end

     0   :  { %vm59_vm0 = vcmask 523264   ;;  %vm85_vm1 = vcmask 261120   ;;  %v109_v22 = vlaneseq  ;;  %vm133_vm7 = vcmask 257024   ;;  %s234_s1 = inlined_call_operand.vmem [shape: bf16[64,32], index: 1, kind: input, shape index: {}]   ;;  %s235_s3 = inlined_call_operand.vmem [shape: f32[32,32], index: 3, kind: input, shape index: {}]   ;;  %s236_s2 = inlined_call_operand.vmem [shape: f32[1,32], index: 2, kind: input, shape index: {}]   ;;  %s237_s0 = inlined_call_operand.vmem [shape: f32[8,64], index: 0, kind: input, shape index: {}]   ;;  %s238_s4 = inlined_call_operand.vmem [shape: f32[1,32], index: 4, kind: input, shape index: {}]   ;;  %s239_s5 = inlined_call_operand.vmem [shape: bf16[8,32], index: 5, kind: output, shape index: {}]  }
   0x1   :  { %v161_v0 = vld [vmem:[%s234_s1 + $0x18] sm:$0xff]  ;;  %v160_v2 = vld [vmem:[%s234_s1 + $0x10] sm:$0xff]  ;;  %v159_v3 = vld [vmem:[%s234_s1 + $0x8] sm:$0xff] }
   0x2   :  { %v80_v1 = vld [vmem:[%s235_s3 + $0x18] sm:$0xff]  ;;  %67 = vmatpush.bf16.msra.mxu0 %v161_v0  ;;  %v158_v4 = vld [vmem:[%s234_s1] sm:$0xff]  ;;  %v79_v7 = vld [vmem:[%s235_s3 + $0x10] sm:$0xff]  ;;  %v110_v25 = vand.u32 127, %v109_v22 }
   0x3   :  { %101 = vmatpush.msra.mxu1 %v80_v1  ;;  %v21_v5 = vld [vmem:[%s237_s0] sm:$0xff]  ;;  %v78_v8 = vld [vmem:[%s235_s3 + $0x8] sm:$0xff] }
   0x4   :  { %v22_v6 = vpack.c.bf16 %v21_v5, %v21_v5  ;;  %v77_v9 = vld [vmem:[%s235_s3] sm:$0xff]  ;;  %vm111_vm4 = vcmp.eq.s32.totalorder %v110_v25, 16 }
   0x5   :  { %102 = vmatpush.msra.mxu1 %v79_v7  ;;  %v162_v10 = vld [vmem:[%s236_s2] ss:$0 sm:$0xff] }
   0x6   :  { %68 = vmatpush.bf16.msra.mxu0 %v160_v2  ;;  %v163_v15 = vld [vmem:[%s238_s4] ss:$0 sm:$0xff] }
   0x7   :  { %103 = vmatpush.msra.mxu1 %v78_v8 }
   0x9   :  { %104 = vmatpush.msra.mxu1 %v77_v9 }
   0xa   :  { %69 = vmatpush.bf16.msra.mxu0 %v159_v3 }
   0xe   :  { %70 = vmatpush.bf16.msra.mxu0 %v158_v4 }
  0x11   :  { %155 = vmatmul.msk.bf16.vlgmr.msra.gmra.mxu0 %vm59_vm0, %v22_v6 }
  0x8e   :  { %v72_v11 = vpop.f32.mrf.mxu0 }
  0x8f   :  { %v73_v12 = vadd.f32 %v162_v10, %v72_v11 }
  0x91   :  { %v76_v13 = vmax.f32 %v73_v12, 0.0 }
  0x93   :  { %156 = vmatmul.msk.f32.vlgmr.msra.gmra.mxu1 %vm85_vm1, %v76_v13 }
  0x96   :  { %v74_v14 = vpop.f32.mrf.mxu0 }
 0x110   :  { %v106_v16 = vpop.f32.mrf.mxu1 }
 0x111   :  { %v107_v17 = vadd.f32 %v163_v15, %v106_v16 }
 0x113   :  { %v157_v18 = vmul.f32 -1.442695, %v107_v17 }
 0x115   :  { %164 = vpow2.f32 %v157_v18 }
 0x11b   :  { %v165_v19 = vpop.eup %164 }
 0x11c   :  { %v115_v20 = vadd.f32 1.0, %v165_v19 }
 0x11e   :  { %166 = vrcp.f32 %v115_v20  ;;  %v127_v26 = vand.u32 2147483648, %v115_v20  ;;  %v125_v28 = vand.u32 2147483647, %v115_v20  ;;  %vm121_vm3 = vweird.f32 %v115_v20 }
 0x120   :  { %v128_v30 = vor.u32 1.1754944e-38, %v127_v26  ;;  %vm126_vm6 = vcmp.eq.f32.partialorder %v125_v28, 8.507059e+37 }
 0x124   :  { %v167_v21 = vpop.eup %166 }
 0x125   :  { %v117_v23 = vmul.f32 %v167_v21, %v115_v20  ;;  %vm122_vm2 = vweird.f32 %v167_v21 }
 0x126   :  { %vm123_vm5 = vmor %vm121_vm3, %vm122_vm2 }
 0x127   :  { %v118_v24 = vsub.f32 1.0, %v117_v23 }
 0x129   :  { %v119_v27 = vmul.f32 %v167_v21, %v118_v24 }
 0x12b   :  { %v120_v29 = vadd.f32 %v167_v21, %v119_v27 }
 0x12d   :  { %v124_v31 = vsel %vm123_vm5, %v167_v21, %v120_v29 }
 0x12e   :  { %v129_v32 = vsel %vm126_vm6, %v128_v30, %v124_v31 }
 0x12f   :  { %v131_v33 = vsel %vm111_vm4, %v129_v32, %v107_v17 }
 0x130   :  { %v132_v34 = vpack.c.bf16 %v131_v33, %v131_v33 }
 0x132   :  { %134 = vst.msk [vmem:[%s239_s5] sm:$0xf] %vm133_vm7, %v132_v34 }

</bundles_post_ra>
